<compile_context>
chip_gen: v5e
topology: v5e:2x2
jax: 0.10.0
libtpu: 0.0.40
codegen_flags: <defaults>
</compile_context>

<pallas_src>
import jax
import jax.numpy as jnp
from jax.experimental import pallas as pl
from jax.experimental.pallas import tpu as pltpu

INPUT_SIZE = 28 * 28      # 784 (multiple of 8; used as full-dim lane block)
HIDDEN_SIZE = 128
OUTPUT_SIZE = 10
OUT_PAD = 128             # lane-dense output width (sliced back to 10 outside)
MAX_TB = 512              # rows per grid step; roofline-saturating, VMEM-safe


def _round_up(n, m):
    return ((n + m - 1) // m) * m


def _choose_tb(batch):
    """>=2 grid steps when possible (v7x megacore), multiple of 8, <= MAX_TB."""
    tb = max(8, _round_up(-(-batch // 2), 8))
    return min(MAX_TB, tb)


def mlp_kernel(x_ref, w1_ref, b1_ref, w2_ref, b2_ref, o_ref):
    # Cast activations to bf16 in-kernel (x streams from HBM as f32 once).
    xb = x_ref[...].astype(jnp.bfloat16)
    # fc1: (TB, 784)bf16 @ (784, 128)bf16 -> f32 acc, + f32 bias, ReLU.
    h = jnp.dot(xb, w1_ref[...], preferred_element_type=jnp.float32)
    h = jnp.maximum(h + b1_ref[...], 0.0)
    # fc2: (TB, 128)bf16 @ (128, 128)bf16 -> f32 acc, + f32 bias.
    out = jnp.dot(h.astype(jnp.bfloat16), w2_ref[...],
                  preferred_element_type=jnp.float32)
    # Lane-dense full-width bf16 store (cols 10..127 are zero-weight padding).
    o_ref[...] = (out + b2_ref[...]).astype(o_ref.dtype)


def prepare_params(w1, b1, w2, b2):
    """One-time (model-load) packing: pad fc2 output to 128 lanes, bf16 weights.

    w1: (784, 128) f32, b1: (128,) f32, w2: (128, 10) f32, b2: (10,) f32.
    """
    w1p = w1.astype(jnp.bfloat16)                               # (784, 128)
    b1p = b1.reshape(1, HIDDEN_SIZE).astype(jnp.float32)        # (1, 128)
    w2p = jnp.zeros((HIDDEN_SIZE, OUT_PAD), jnp.bfloat16)
    w2p = w2p.at[:, :OUTPUT_SIZE].set(w2.astype(jnp.bfloat16))  # (128, 128)
    b2p = jnp.zeros((1, OUT_PAD), jnp.float32)
    b2p = b2p.at[0, :OUTPUT_SIZE].set(b2.astype(jnp.float32))   # (1, 128)
    return w1p, b1p, w2p, b2p


def mlp_forward(x, w1p, b1p, w2p, b2p):
    """x: any shape whose trailing dims flatten to 784 (mirrors x.view(-1, 784))."""
    x2d = x.reshape(-1, INPUT_SIZE)
    B = x2d.shape[0]

    TB = _choose_tb(B)
    grid = (-(-B // TB),)   # ragged last block: OOB writes are masked by Pallas

    flops = 2 * B * INPUT_SIZE * HIDDEN_SIZE + 2 * B * HIDDEN_SIZE * OUT_PAD
    bytes_accessed = (B * INPUT_SIZE * 4                # x (f32, read once)
                      + INPUT_SIZE * HIDDEN_SIZE * 2    # w1 (bf16, resident)
                      + HIDDEN_SIZE * 4                 # b1 (f32)
                      + HIDDEN_SIZE * OUT_PAD * 2       # w2 (bf16)
                      + OUT_PAD * 4                     # b2 (f32)
                      + B * OUT_PAD * 2)                # out (bf16)

    out = pl.pallas_call(
        mlp_kernel,
        out_shape=jax.ShapeDtypeStruct((B, OUT_PAD), jnp.bfloat16),
        grid=grid,
        in_specs=[
            pl.BlockSpec((TB, INPUT_SIZE), lambda i: (i, 0)),         # x streams
            pl.BlockSpec((INPUT_SIZE, HIDDEN_SIZE), lambda i: (0, 0)),  # w1 resident
            pl.BlockSpec((1, HIDDEN_SIZE), lambda i: (0, 0)),         # b1 resident
            pl.BlockSpec((HIDDEN_SIZE, OUT_PAD), lambda i: (0, 0)),   # w2 resident
            pl.BlockSpec((1, OUT_PAD), lambda i: (0, 0)),             # b2 resident
        ],
        out_specs=pl.BlockSpec((TB, OUT_PAD), lambda i: (i, 0)),
        compiler_params=pltpu.CompilerParams(
            dimension_semantics=("parallel",),
        ),
        cost_estimate=pl.CostEstimate(
            flops=flops, transcendentals=0, bytes_accessed=bytes_accessed),
    )(x2d, w1p, b1p, w2p, b2p)

    # Module semantics: (B, 10) logits.  Consumers that can accept the padded
    # lane-dense bf16 block should use `out` directly and skip this slice.
    return out[:, :OUTPUT_SIZE].astype(jnp.float32)


def init_params(key):
    """Deterministic init matching nn.Linear's default U(-1/sqrt(fan_in), ...)."""
    k1, k2, k3, k4 = jax.random.split(key, 4)
    bound1 = 1.0 / jnp.sqrt(jnp.float32(INPUT_SIZE))
    bound2 = 1.0 / jnp.sqrt(jnp.float32(HIDDEN_SIZE))
    # Stored pre-transposed: (in_features, out_features)
    w1 = jax.random.uniform(k1, (INPUT_SIZE, HIDDEN_SIZE), jnp.float32, -bound1, bound1)
    b1 = jax.random.uniform(k2, (HIDDEN_SIZE,), jnp.float32, -bound1, bound1)
    w2 = jax.random.uniform(k3, (HIDDEN_SIZE, OUTPUT_SIZE), jnp.float32, -bound2, bound2)
    b2 = jax.random.uniform(k4, (OUTPUT_SIZE,), jnp.float32, -bound2, bound2)
    return w1, b1, w2, b2


if __name__ == "__main__":
    key = jax.random.PRNGKey(0)
    kx, kp = jax.random.split(key)

    # Small batch of MNIST-like inputs (B, 1, 28, 28) -> flattened inside forward.
    # B=24 with TB=16 exercises a 2-step grid plus a ragged (masked) last block.
    B = 24
    x = jax.random.normal(kx, (B, 1, 28, 28), dtype=jnp.float32)
    w1, b1, w2, b2 = init_params(kp)
    w1p, b1p, w2p, b2p = prepare_params(w1, b1, w2, b2)

    out = mlp_forward(x, w1p, b1p, w2p, b2p)
    out = jax.block_until_ready(out)
    assert out.shape == (B, OUTPUT_SIZE)

    # Reference 1: same bf16 quantization of x / w1 / h / w2, f32 math ->
    # tight tolerance (only MXU accumulation order + bf16 output rounding).
    x2d = x.reshape(-1, INPUT_SIZE)
    xb = x2d.astype(jnp.bfloat16).astype(jnp.float32)
    w1b = w1.astype(jnp.bfloat16).astype(jnp.float32)
    w2b = w2.astype(jnp.bfloat16).astype(jnp.float32)
    h = jnp.maximum(xb @ w1b + b1, 0.0)
    ref_bf16 = h.astype(jnp.bfloat16).astype(jnp.float32) @ w2b + b2
    assert jnp.allclose(out, ref_bf16, atol=1e-2, rtol=1e-2)

    # Reference 2: original full-f32 module semantics -> loose tolerance
    # (bf16 weight/activation quantization only).
    ref_f32 = jnp.maximum(x2d @ w1 + b1, 0.0) @ w2 + b2
    assert jnp.allclose(out, ref_f32, atol=7e-2, rtol=7e-2)

    print("KERNEL_OK")
</pallas_src>

<mosaic_0001>
module attributes {stable_mosaic.version = 11 : i64} {
  func.func @mlp_kernel(%arg0: i32, %arg1: memref<16x784xf32, #tpu.memory_space<vmem>>, %arg2: memref<784x128xbf16, #tpu.memory_space<vmem>>, %arg3: memref<1x128xf32, #tpu.memory_space<vmem>>, %arg4: memref<128x128xbf16, #tpu.memory_space<vmem>>, %arg5: memref<1x128xf32, #tpu.memory_space<vmem>>, %arg6: memref<16x128xbf16, #tpu.memory_space<vmem>>) attributes {dimension_semantics = [#tpu.dimension_semantics<parallel>], iteration_bounds = array<i64: 2>, scalar_prefetch = 0 : i64, scratch_operands = 0 : i64, tpu.core_type = #tpu.core_type<tc>, window_params = [{transform_indices = @transform_0, window_bounds = array<i64: 16, 784>}, {pipeline_mode = #tpu.pipeline_mode<synchronous>, transform_indices = @transform_1, window_bounds = array<i64: 784, 128>}, {pipeline_mode = #tpu.pipeline_mode<synchronous>, transform_indices = @transform_2, window_bounds = array<i64: 1, 128>}, {pipeline_mode = #tpu.pipeline_mode<synchronous>, transform_indices = @transform_3, window_bounds = array<i64: 128, 128>}, {pipeline_mode = #tpu.pipeline_mode<synchronous>, transform_indices = @transform_4, window_bounds = array<i64: 1, 128>}, {transform_indices = @transform_5, window_bounds = array<i64: 16, 128>}]} {
    %c0 = arith.constant 0 : index
    %c0_0 = arith.constant 0 : index
    %0 = vector.load %arg1[%c0, %c0_0] : memref<16x784xf32, #tpu.memory_space<vmem>>, vector<16x784xf32>
    %1 = arith.truncf %0 : vector<16x784xf32> to vector<16x784xbf16>
    %c0_1 = arith.constant 0 : index
    %c0_2 = arith.constant 0 : index
    %2 = vector.load %arg2[%c0_1, %c0_2] : memref<784x128xbf16, #tpu.memory_space<vmem>>, vector<784x128xbf16>
    %cst = arith.constant dense<0.000000e+00> : vector<16x128xf32>
    %3 = tpu.matmul %1, %2, %cst {dimension_numbers = #tpu.dot_dimension_numbers<[1], [0], [0], [1], [0, 0, 1, 1], [], []>} : vector<16x784xbf16>, vector<784x128xbf16>, vector<16x128xf32> -> vector<16x128xf32>
    %c0_3 = arith.constant 0 : index
    %c0_4 = arith.constant 0 : index
    %4 = vector.load %arg3[%c0_3, %c0_4] : memref<1x128xf32, #tpu.memory_space<vmem>>, vector<1x128xf32>
    %5 = vector.broadcast %4 : vector<1x128xf32> to vector<16x128xf32>
    %6 = arith.addf %3, %5 : vector<16x128xf32>
    %cst_5 = arith.constant 0.000000e+00 : f32
    %7 = vector.broadcast %cst_5 : f32 to vector<16x128xf32>
    %8 = arith.maximumf %6, %7 : vector<16x128xf32>
    %9 = arith.truncf %8 : vector<16x128xf32> to vector<16x128xbf16>
    %c0_6 = arith.constant 0 : index
    %c0_7 = arith.constant 0 : index
    %10 = vector.load %arg4[%c0_6, %c0_7] : memref<128x128xbf16, #tpu.memory_space<vmem>>, vector<128x128xbf16>
    %cst_8 = arith.constant dense<0.000000e+00> : vector<16x128xf32>
    %11 = tpu.matmul %9, %10, %cst_8 {dimension_numbers = #tpu.dot_dimension_numbers<[1], [0], [0], [1], [0, 0, 1, 1], [], []>} : vector<16x128xbf16>, vector<128x128xbf16>, vector<16x128xf32> -> vector<16x128xf32>
    %c0_9 = arith.constant 0 : index
    %c0_10 = arith.constant 0 : index
    %12 = vector.load %arg5[%c0_9, %c0_10] : memref<1x128xf32, #tpu.memory_space<vmem>>, vector<1x128xf32>
    %13 = vector.broadcast %12 : vector<1x128xf32> to vector<16x128xf32>
    %14 = arith.addf %11, %13 : vector<16x128xf32>
    %15 = arith.truncf %14 : vector<16x128xf32> to vector<16x128xbf16>
    %c0_11 = arith.constant 0 : index
    %c0_12 = arith.constant 0 : index
    %16 = vector.load %arg6[%c0_11, %c0_12] : memref<16x128xbf16, #tpu.memory_space<vmem>>, vector<16x128xbf16>
    tpu.vector_store %arg6[%c0_11, %c0_12], %15 {strides = array<i32>} : memref<16x128xbf16, #tpu.memory_space<vmem>>, vector<16x128xbf16>,
    return
  }
  func.func @transform_0(%arg0: i32) -> (i32, i32) {
    %c0_i32 = arith.constant 0 : i32
    %c0_i32_0 = arith.constant 0 : i32
    return %arg0, %c0_i32 : i32, i32
  }
  func.func @transform_1(%arg0: i32) -> (i32, i32) {
    %c0_i32 = arith.constant 0 : i32
    %c0_i32_0 = arith.constant 0 : i32
    %c0_i32_1 = arith.constant 0 : i32
    return %c0_i32, %c0_i32_0 : i32, i32
  }
  func.func @transform_2(%arg0: i32) -> (i32, i32) {
    %c0_i32 = arith.constant 0 : i32
    %c0_i32_0 = arith.constant 0 : i32
    %c0_i32_1 = arith.constant 0 : i32
    return %c0_i32, %c0_i32_0 : i32, i32
  }
  func.func @transform_3(%arg0: i32) -> (i32, i32) {
    %c0_i32 = arith.constant 0 : i32
    %c0_i32_0 = arith.constant 0 : i32
    %c0_i32_1 = arith.constant 0 : i32
    return %c0_i32, %c0_i32_0 : i32, i32
  }
  func.func @transform_4(%arg0: i32) -> (i32, i32) {
    %c0_i32 = arith.constant 0 : i32
    %c0_i32_0 = arith.constant 0 : i32
    %c0_i32_1 = arith.constant 0 : i32
    return %c0_i32, %c0_i32_0 : i32, i32
  }
  func.func @transform_5(%arg0: i32) -> (i32, i32) {
    %c0_i32 = arith.constant 0 : i32
    %c0_i32_0 = arith.constant 0 : i32
    return %arg0, %c0_i32 : i32, i32
  }
}

</mosaic_0001>

<bundles_post_ra>
// kernel: tpu_custom_call.1
= control target key start
LH: loop header
LB: loop body
LE: loop exit
PB: predicated region body
PF: predicated region fallthrough
CT: control target
= control target key end

     0   :  { %s1853_s0 = inlined_call_operand.hbm [shape: f32[24,784], index: 0, kind: input, shape index: {}]   ;;  %s1854_s1 = inlined_call_operand.hbm [shape: bf16[784,128], index: 1, kind: input, shape index: {}]   ;;  %s1855_s2 = inlined_call_operand.vmem [shape: f32[1,128], index: 2, kind: input, shape index: {}]   ;;  %s1856_s3 = inlined_call_operand.hbm [shape: bf16[128,128], index: 3, kind: input, shape index: {}]   ;;  %s1857_s4 = inlined_call_operand.vmem [shape: f32[1,128], index: 4, kind: input, shape index: {}]   ;;  %s1858_s5 = inlined_call_operand.hbm [shape: bf16[24,128], index: 5, kind: output, shape index: {}]  }
   0x1   :  { %1863 = sst [smem:[#allocation13_spill]] %s1854_s1 }
   0x2   :  { %1864 = sst [smem:[#allocation14_spill]] %s1856_s3 }
   0x3   :  { %10 = vsyncpa [#allocation3], 0 }
   0x4   :  { %12 = vsyncpa [#allocation3 + $0x1], 0 }
   0x5   :  { %13 = vsyncpa [#allocation6], 0 }
   0x6   :  { %14 = vsyncpa [#allocation4], 0 }
   0x7   :  { %16 = vsyncpa [#allocation4 + $0x1], 0  ;;  %s1632_s18 = smov 0   ;;  %s1634_s19 = smov 0  }
   0x8   :  { %s1636_s20 = smov 0   ;;  %s1638_s21 = smov 0  }
   0x9 LB: > { %s1653_s22 = sadd.s32 4294967295, %s1590_s21   ;;  %s1022_s23 = sadd.s32 4294967294, %s1590_s21   ;;  %s1590_s21 = sphi %s1638_s21, %s1884_s21   ;;  %s1586_s20 = sphi %s1636_s20, %s1883_s20   ;;  %s1582_s19 = sphi %s1634_s19, %s1882_s19   ;;  %s1578_s18 = sphi %s1632_s18, %s1881_s18  }
   0xa   : > { %s1657_s24 = sadd.s32 1, %s1590_s21   ;;  %s29_s25 = sadd.s32 1, %s1586_s20 }
   0xb   : > { %s26_s26 = ssub.s32 %s1590_s21, %s1657_s24  ;;  %p36_p0 = scmp.ne.s32.totalorder %s1586_s20, %s1582_s19 }
   0xc   : > { %p27_p1 = scmp.eq.s32.totalorder %s26_s26, 0  ;;  %p37_p2 = scmp.eq.s32.totalorder %s1590_s21, 0 }
   0xd   : > { %p42_p3 = scmp.ne.s32.totalorder %s1582_s19, %s1578_s18  ;;  %p1862_p4 = scmp.eq.s32.totalorder %s1653_s22, 0 }
   0xe   : > { %s1669_s27 = scalar_select %p27_p1, %s1586_s20, %s29_s25  }
   0xf   : > { %p1671_p5 = por %p37_p2, %p36_p0  ;;  %p1677_p6 = por %p1862_p4, %p42_p3 }
  0x10   : > { %p150_p7 = scmp.eq.s32.totalorder %s1653_s22, 1  ;;  %p156_p8 = scmp.eq.s32.totalorder %s1022_s23, 1 }
  0x11   : > { %p1023_p9 = scmp.ge.s32.totalorder %s1590_s21, 1  ;;  %p163_p10 = scmp.lt.s32.totalorder %s1590_s21, 3 }
  0x12   : > { %p1684_p11 = por %p150_p7, %p36_p0  ;;  %p1688_p12 = por %p156_p8, %p42_p3 }
  0x13   : > { %p1692_p13 = pnand %p1023_p9, %p163_p10  ;;  %s1870_s1 = sld [smem:[#allocation13_spill]] }
  0x14   : > { %s1868_s6 = scalar_select %p1688_p12, 1, 0 }
  0x15   : > { %p1352_p1 = pneg %p1692_p13  ;;  %s1592_s11 = smov [#allocation5]  }
  0x16   : > { %s176_s12 = sshll.u32 %s1592_s11, 4  ;;  %s1871_s3 = sld [smem:[#allocation14_spill]]  ;;  %s177_s12 = int_to_ptr.vmem [resolvable:$true] %s176_s12 }
  0x17   : > { %p1353_p0 = pnand %p1352_p1, %p1862_p4  ;;  %s1593_s16 = smov 64  }
  0x18   : > { %s1594_s17 = smov 4   ;;  %s1595_s23 = smov [#allocation7]  }
  0x19   : > { %s174_s10 = sshll.u32 %s1870_s1, 4  ;;  %s193_s25 = sshll.u32 %s1595_s23, 4  ;;  %s175_s10 = int_to_ptr.hbm [resolvable:$true] %s174_s10  ;;  %s194_s25 = int_to_ptr.vmem [resolvable:$true] %s193_s25 }
  0x1a   : > { %1355 = dma.hbm_to_vmem [thread:$0]  (!%p1353_p0), %s175_s10, 6272, %s177_s12, [#allocation6], %s1593_s16, %s1593_s16, %s1594_s17  }
  0x1b   : > { %p1861_p2 = scmp.ge.s32.totalorder %s1590_s21, 2 }
  0x1c   : > { %s191_s15 = sshll.u32 %s1871_s3, 4  ;;  %s192_s15 = int_to_ptr.hbm [resolvable:$true] %s191_s15 }
  0x1d   : > { %1358 = dma.hbm_to_vmem [thread:$0]  (!%p1353_p0), %s192_s15, 1024, %s194_s25, [#allocation6], %s1593_s16, %s1593_s16, %s1594_s17  }
  0x1e   : > { %206 = sbr.rel (%p1861_p2) target bundleno = 87 (0x57), region = 32 }
  0x23   : > { %209 = sbr.rel (!%p1671_p5) target bundleno = 87 (0x57), region = 36 }
  0x28   : > { %s210_s26 = sand.u32 1, %s1586_s20   ;;  %s1027_s8 = sshll.u32 %s1590_s21, 1 }
  0x29   : > { %s1339_s9 = smul.u32 112, %s210_s26  ;;  %s216_s11 = ssub.s32 3, %s1027_s8 }
  0x2a   : > { %p217_p3 = scmp.lt.s32.totalorder %s216_s11, 2  ;;  %s1713_s14 = scalar_lea.sflag [#allocation3], %s210_s26 }
  0x2b   : > { %s214_s15 = scalar_lea.vmem [#allocation2], %s1339_s9 }
  0x2c   : > { %s1886_s11 = smov (!%p217_p3, %s216_s11), 2 }
  0x2d   : > { %s1029_s10 = smul.u32 56, %s1886_s11 }
  0x2f   : > { %s221_s12 = ssub.s32 112, %s1029_s10 }
  0x30   : > { %s222_s13 = sshll.u32 %s221_s12, 4 }
  0x31   : > { %223 = vsyncadd %s1713_s14, %s222_s13  ;;  %p1716_p7 = scmp.ne.s32.totalorder %s1029_s10, 0  ;;  %s1340_s16 = smul.u32 112, %s1590_s21 }
  0x32   : > { %s1721_s17 = sshll.u32 %s214_s15, 4  ;;  %s1723_s23 = smul.u32 896, %s1886_s11 }
  0x33   : > { %1873 = sst [smem:[#allocation12_spill]] %s1721_s17  ;;  %s227_s26 = scalar_lea.hbm %s1853_s0, %s1340_s16 }
  0x34   : > { %s229_s9 = sshll.u32 %s227_s26, 4  ;;  %s1472_s12 = sshrl.u32 %s1723_s23, 4  ;;  %s1729_s9 = int_to_ptr.hbm [resolvable:$true] %s229_s9 }
  0x35   : > { %s1470_s10 = sshra.s32 %s1729_s9, 4  ;;  %s1508_s13 = sshll.u32 %s1472_s12, 4  ;;  %s1471_s10 = int_to_ptr.hbm [resolvable:$true] %s1470_s10 }
  0x36   : > { %p1474_p5 = scmp.ne.s32.totalorder %s1508_s13, %s1723_s23  ;;  %s1475_s15 = sadd.s32 1, %s1472_s12 }
  0x37   : > { %s1481_s16 = scalar_lea.hbm %s1853_s0, 168  ;;  %p1482_p1 = scmp.lt.s32.totalorder %s1471_s10, %s1853_s0 }
  0x38   : > { %s1888_s15 = smov (!%p1474_p5, %s1475_s15), %s1472_s12 }
  0x39   : > { %s1477_s11 = scalar_lea.hbm %s1471_s10, %s1888_s15 }
  0x3a   : > { %p1478_p8 = scmp.ne.s32.totalorder %s1471_s10, %s1477_s11  ;;  %p1483_p0 = scmp.lt.s32.totalorder %s1481_s16, %s1477_s11 }
  0x3c   : > { %p1479_p9 = pnand %p1478_p8, %p1716_p7  ;;  %p1484_p3 = por %p1483_p0, %p1482_p1 }
  0x3e   : > { %p1480_p10 = pneg %p1479_p9 }
  0x40   : > { %p1485_p2 = pnand %p1484_p3, %p1480_p10 }
  0x42   : > { %1488 = shalt.err (!%p1485_p2)
}
  0x43   : > { %s1874_s13 = sld [smem:[#allocation12_spill]]  ;;  %s1596_s25 = smov [#allocation2]  }
  0x44   : > { %s1500_s8 = scalar_lea.vmem %s1596_s25, 224 }
  0x49   : > { %s1875_s1 = int_to_ptr.vmem [resolvable:$true] %s1874_s13 }
  0x4a   : > { %s1489_s12 = sshra.s32 %s1875_s1, 4  ;;  %s1490_s12 = int_to_ptr.vmem [resolvable:$true] %s1489_s12 }
  0x4b   : > { %s1496_s3 = scalar_lea.vmem %s1490_s12, %s1888_s15 }
  0x4c   : > { %p1497_p5 = scmp.ne.s32.totalorder %s1490_s12, %s1496_s3  ;;  %p1502_p4 = scmp.lt.s32.totalorder %s1500_s8, %s1496_s3 }
  0x4e   : > { %p1498_p8 = pnand %p1497_p5, %p1716_p7 }
  0x50   : > { %p1499_p9 = pneg %p1498_p8 }
  0x52   : > { %p1504_p12 = pnand %p1502_p4, %p1499_p9 }
  0x54   : > { %1507 = shalt.err (!%p1504_p12)
}
  0x55   : > { %s1597_s17 = smov 896   ;;  %s1598_s10 = smov 56  }
  0x56   : > { %237 = dma.hbm_to_vmem [thread:$0]  (%p1716_p7), %s1729_s9, %s1723_s23, %s1875_s1, %s1713_s14, %s1597_s17, %s1597_s17, %s1598_s10  }
  0x57 PF: > { %243 = sbr.rel (%p1692_p13) target bundleno = 480 (0x1e0), region = 40  ;;  %s1756_s3 = sand.u32 (!%p1692_p13), 1, %s1582_s19  }
  0x58   : > { %s1341_s15 = smul.u32 (!%p1692_p13), 112, %s1756_s3  ;;  %s246_s11 = scalar_lea.sflag (!%p1692_p13), [#allocation3], %s1756_s3 }
  0x5a   : > { %s1760_s16 = scalar_lea.vmem (!%p1692_p13), [#allocation2], %s1341_s15 }
  0x5c   : > { %1565 = dma.done.wait (%p1677_p6), %s246_s11, 1792  }
  0x5d   : > { %1567 = vsyncadd (%p1677_p6), %s246_s11, 4294965504  ;;  %p1876_p4 = scmp.eq.s32.totalorder %s1653_s22, 0 }
  0x5f   : > { %1569 = dma.done.wait (%p1876_p4), [#allocation6], 7296   ;;  %p1877_p12 = pmov %p1876_p4 }
  0x60   : > { %v1283_v0 = vld [vmem:[#allocation5 + $0x38] sm:$0xff]  ;;  %v1282_v4 = vld [vmem:[#allocation5 + $0x30] sm:$0xff]  ;;  %v1281_v8 = vld [vmem:[#allocation5 + $0x28] sm:$0xff]  ;;  %vm716_vm0 = vcmask 130048   ;;  %s1037_s23 = sshll.u32 %s1756_s3, 3  ;;  %s908_s26 = scalar_lea.sflag [#allocation4], %s1756_s3 }
  0x61   : > { %1571 = vsyncadd (%p1877_p12), [#allocation6], 4294960000  ;;  %v1291_v1 = vld [vmem:[#allocation5 + $0x78] sm:$0xff]  ;;  %720 = vmatpush.bf16.msra.mxu0 %v1283_v0  ;;  %v1290_v5 = vld [vmem:[#allocation5 + $0x70] sm:$0xff]  ;;  %s286_s9 = scalar_lea.vmem [#allocation8], %s1037_s23  ;;  %s1268_s13 = sshll.u32 (%p1684_p11), %s1653_s22, 1 }
  0x62   : > { %v1299_v2 = vld [vmem:[#allocation5 + $0xb8] sm:$0xff]  ;;  %734 = vmatpush.bf16.msra.mxu1 %v1291_v1  ;;  %v1298_v6 = vld [vmem:[#allocation5 + $0xb0] sm:$0xff]  ;;  %v1289_v9 = vld [vmem:[#allocation5 + $0x68] sm:$0xff]  ;;  %s916_s12 = ssub.s32 (%p1684_p11), 3, %s1268_s13 }
  0x63   : > { %v1307_v3 = vld [vmem:[#allocation5 + $0xf8] sm:$0xff]  ;;  %748 = vmatpush.bf16.msra.mxu2 %v1299_v2  ;;  %v1306_v7 = vld [vmem:[#allocation5 + $0xf0] sm:$0xff]  ;;  %v1297_v10 = vld [vmem:[#allocation5 + $0xa8] sm:$0xff]  ;;  %p917_p6 = scmp.lt.s32.totalorder (%p1684_p11), %s916_s12, 2 }
  0x64   : > { %762 = vmatpush.bf16.msra.mxu3 %v1307_v3  ;;  %v1305_v11 = vld [vmem:[#allocation5 + $0xe8] sm:$0xff]  ;;  %v1280_v12 = vld [vmem:[#allocation5 + $0x20] sm:$0xff]  ;;  %v1279_v16 = vld [vmem:[#allocation5 + $0x18] sm:$0xff] }
  0x65   : > { %721 = vmatpush.bf16.msra.mxu0 %v1282_v4  ;;  %v1288_v13 = vld [vmem:[#allocation5 + $0x60] sm:$0xff]  ;;  %v1287_v17 = vld [vmem:[#allocation5 + $0x58] sm:$0xff]  ;;  %v1278_v20 = vld [vmem:[#allocation5 + $0x10] sm:$0xff] }
  0x66   : > { %735 = vmatpush.bf16.msra.mxu1 %v1290_v5  ;;  %v1296_v14 = vld [vmem:[#allocation5 + $0xa0] sm:$0xff]  ;;  %v1295_v18 = vld [vmem:[#allocation5 + $0x98] sm:$0xff]  ;;  %v1286_v21 = vld [vmem:[#allocation5 + $0x50] sm:$0xff] }
  0x67   : > { %749 = vmatpush.bf16.msra.mxu2 %v1298_v6  ;;  %v1304_v15 = vld [vmem:[#allocation5 + $0xe0] sm:$0xff]  ;;  %v1303_v19 = vld [vmem:[#allocation5 + $0xd8] sm:$0xff]  ;;  %v1294_v22 = vld [vmem:[#allocation5 + $0x90] sm:$0xff] }
  0x68   : > { %763 = vmatpush.bf16.msra.mxu3 %v1306_v7  ;;  %v1302_v23 = vld [vmem:[#allocation5 + $0xd0] sm:$0xff]  ;;  %v1277_v24 = vld [vmem:[#allocation5 + $0x8] sm:$0xff]  ;;  %v1276_v28 = vld [vmem:[#allocation5] sm:$0xff] }
  0x69   : > { %722 = vmatpush.bf16.msra.mxu0 %v1281_v8  ;;  %v1285_v25 = vld [vmem:[#allocation5 + $0x48] sm:$0xff]  ;;  %v1284_v29 = vld [vmem:[#allocation5 + $0x40] sm:$0xff]  ;;  %v1315_v34 = vld [vmem:[#allocation5 + $0x138] sm:$0xff] }
  0x6a   : > { %736 = vmatpush.bf16.msra.mxu1 %v1289_v9  ;;  %v1293_v26 = vld [vmem:[#allocation5 + $0x88] sm:$0xff]  ;;  %v299_v30 = vld [vmem:[%s1760_s16] sm:$0xff]  ;;  %v1323_v35 = vld [vmem:[#allocation5 + $0x178] sm:$0xff] }
  0x6b   : > { %750 = vmatpush.bf16.msra.mxu2 %v1297_v10  ;;  %v1301_v27 = vld [vmem:[#allocation5 + $0xc8] sm:$0xff]  ;;  %v307_v33 = vld [vmem:[%s1760_s16 + $0x40] sm:$0xff]  ;;  %v301_v38 = vld [vmem:[%s1760_s16 + $0x10] sm:$0xff] }
  0x6c   : > { %764 = vmatpush.bf16.msra.mxu3 %v1305_v11  ;;  %v306_v31 = vld [vmem:[%s1760_s16 + $0x38] sm:$0xff]  ;;  %v300_v32 = vld [vmem:[%s1760_s16 + $0x8] sm:$0xff]  ;;  %v1292_v36 = vld [vmem:[#allocation5 + $0x80] sm:$0xff] }
  0x6d   : > { %723 = vmatpush.bf16.msra.mxu0 %v1280_v12  ;;  %v1300_v37 = vld [vmem:[#allocation5 + $0xc0] sm:$0xff]  ;;  %v308_v39 = vld [vmem:[%s1760_s16 + $0x48] sm:$0xff]  ;;  %v313_v40 = vpack.c.bf16 %v306_v31, %v299_v30  ;;  %v302_v41 = vld [vmem:[%s1760_s16 + $0x18] sm:$0xff]  ;;  %v314_v43 = vpack.c.bf16 %v307_v33, %v300_v32 }
  0x6e   : > { %737 = vmatpush.bf16.msra.mxu1 %v1288_v13  ;;  %v309_v42 = vld [vmem:[%s1760_s16 + $0x50] sm:$0xff]  ;;  %v315_v47 = vpack.c.bf16 %v308_v39, %v301_v38  ;;  %v1313_v49 = vld [vmem:[#allocation5 + $0x128] sm:$0xff]  ;;  %v1311_v53 = vld [vmem:[#allocation5 + $0x118] sm:$0xff] }
  0x6f   : > { %751 = vmatpush.bf16.msra.mxu2 %v1296_v14  ;;  %v1324_v44 = vld [vmem:[#allocation5 + $0x180] sm:$0xff]  ;;  %v1314_v45 = vld [vmem:[#allocation5 + $0x130] sm:$0xff]  ;;  %v316_v48 = vpack.c.bf16 %v309_v42, %v302_v41  ;;  %v1321_v50 = vld [vmem:[#allocation5 + $0x168] sm:$0xff] }
  0x70   : > { %765 = vmatpush.bf16.msra.mxu3 %v1304_v15  ;;  %v1322_v46 = vld [vmem:[#allocation5 + $0x170] sm:$0xff]  ;;  %v1312_v51 = vld [vmem:[#allocation5 + $0x120] sm:$0xff]  ;;  %v1319_v54 = vld [vmem:[#allocation5 + $0x158] sm:$0xff] }
  0x71   : > { %724 = vmatpush.bf16.msra.mxu0 %v1279_v16  ;;  %v1320_v52 = vld [vmem:[#allocation5 + $0x160] sm:$0xff]  ;;  %v312_v56 = vld [vmem:[%s1760_s16 + $0x68] sm:$0xff]  ;;  %v1310_v57 = vld [vmem:[#allocation5 + $0x110] sm:$0xff] }
  0x72   : > { %738 = vmatpush.bf16.msra.mxu1 %v1287_v17  ;;  %v305_v55 = vld [vmem:[%s1760_s16 + $0x30] sm:$0xff]  ;;  %v1309_v60 = vld [vmem:[#allocation5 + $0x108] sm:$0xff]  ;;  %v303_v0 = vld [vmem:[%s1760_s16 + $0x20] sm:$0xff] }
  0x73   : > { %752 = vmatpush.bf16.msra.mxu2 %v1295_v18  ;;  %v1318_v58 = vld [vmem:[#allocation5 + $0x150] sm:$0xff]  ;;  %v319_v59 = vpack.c.bf16 %v312_v56, %v305_v55  ;;  %v1317_v61 = vld [vmem:[#allocation5 + $0x148] sm:$0xff]  ;;  %v1308_v62 = vld [vmem:[#allocation5 + $0x100] sm:$0xff] }
  0x74   : > { %766 = vmatpush.bf16.msra.mxu3 %v1303_v19  ;;  %v1316_v63 = vld [vmem:[#allocation5 + $0x140] sm:$0xff]  ;;  %v310_v1 = vld [vmem:[%s1760_s16 + $0x58] sm:$0xff]  ;;  %v304_v2 = vld [vmem:[%s1760_s16 + $0x28] sm:$0xff] }
  0x75   : > { %725 = vmatpush.bf16.msra.mxu0 %v1278_v20  ;;  %v311_v3 = vld [vmem:[%s1760_s16 + $0x60] sm:$0xff]  ;;  %v317_v4 = vpack.c.bf16 %v310_v1, %v303_v0  ;;  %v1331_v7 = vld [vmem:[#allocation7 + $0x30] sm:$0xff]  ;;  %v1329_v9 = vld [vmem:[#allocation7 + $0x20] sm:$0xff] }
  0x76   : > { %739 = vmatpush.bf16.msra.mxu1 %v1286_v21  ;;  %v318_v5 = vpack.c.bf16 %v311_v3, %v304_v2  ;;  %v1332_v6 = vld [vmem:[#allocation7 + $0x38] sm:$0xff]  ;;  %v1330_v8 = vld [vmem:[#allocation7 + $0x28] sm:$0xff]  ;;  %v1327_v11 = vld [vmem:[#allocation7 + $0x10] sm:$0xff] }
  0x77   : > { %753 = vmatpush.bf16.msra.mxu2 %v1294_v22  ;;  %v1328_v10 = vld [vmem:[#allocation7 + $0x18] sm:$0xff]  ;;  %v1326_v12 = vld [vmem:[#allocation7 + $0x8] sm:$0xff]  ;;  %v1325_v16 = vld [vmem:[#allocation7] sm:$0xff] }
  0x78   : > { %767 = vmatpush.bf16.msra.mxu3 %v1302_v23  ;;  %v1408_v17 = vld [vmem:[%s1855_s2] ss:$0 sm:$0xff] }
  0x79   : > { %726 = vmatpush.bf16.msra.mxu0 %v1277_v24 }
  0x7a   : > { %740 = vmatpush.bf16.msra.mxu1 %v1285_v25 }
  0x7b   : > { %754 = vmatpush.bf16.msra.mxu2 %v1293_v26 }
  0x7c   : > { %768 = vmatpush.bf16.msra.mxu3 %v1301_v27 }
  0x7d   : > { %727 = vmatpush.bf16.msra.mxu0 %v1276_v28 }
  0x7e   : > { %741 = vmatpush.bf16.msra.mxu1 %v1284_v29 }
  0x7f   : > { %755 = vmatpush.bf16.msra.mxu2 %v1292_v36 }
  0x80   : > { %769 = vmatpush.bf16.msra.mxu3 %v1300_v37  ;;  %728 = vmatmul.bf16.vlgmr.msra.gmra.mxu0 %v313_v40 }
  0x81   : > { %776 = vmatpush.bf16.msrb.mxu0 %v1315_v34  ;;  %742 = vmatmul.bf16.vlgmr.msra.gmra.mxu1 %v314_v43 }
  0x82   : > { %790 = vmatpush.bf16.msrb.mxu1 %v1323_v35  ;;  %756 = vmatmul.bf16.vlgmr.msra.gmra.mxu2 %v315_v47  ;;  %v1409_v47 = vld [vmem:[%s1857_s4] ss:$0 sm:$0xff] }
  0x83   : > { %811 = vmatpush.bf16.msrb.mxu2 %v1324_v44  ;;  %770 = vmatmul.bf16.vlgmr.msra.gmra.mxu3 %v316_v48 }
  0x84   : > { %889 = vmatpush.bf16.msrb.mxu3 %v1332_v6 }
  0x85   : > { %777 = vmatpush.bf16.msrb.mxu0 %v1314_v45 }
  0x86   : > { %791 = vmatpush.bf16.msrb.mxu1 %v1322_v46 }
  0x88   : > { %890 = vmatpush.bf16.msrb.mxu3 %v1331_v7 }
  0x89   : > { %778 = vmatpush.bf16.msrb.mxu0 %v1313_v49 }
  0x8a   : > { %792 = vmatpush.bf16.msrb.mxu1 %v1321_v50 }
  0x8c   : > { %891 = vmatpush.bf16.msrb.mxu3 %v1330_v8 }
  0x8d   : > { %779 = vmatpush.bf16.msrb.mxu0 %v1312_v51 }
  0x8e   : > { %793 = vmatpush.bf16.msrb.mxu1 %v1320_v52 }
  0x90   : > { %892 = vmatpush.bf16.msrb.mxu3 %v1329_v9 }
  0x91   : > { %780 = vmatpush.bf16.msrb.mxu0 %v1311_v53 }
  0x92   : > { %794 = vmatpush.bf16.msrb.mxu1 %v1319_v54  ;;  %1234 = vmatmul.msk.bf16.vlgmr.msrb.gmra.mxu2 %vm716_vm0, %v319_v59 }
  0x94   : > { %893 = vmatpush.bf16.msrb.mxu3 %v1328_v10 }
  0x95   : > { %781 = vmatpush.bf16.msrb.mxu0 %v1310_v57 }
  0x96   : > { %795 = vmatpush.bf16.msrb.mxu1 %v1318_v58 }
  0x98   : > { %894 = vmatpush.bf16.msrb.mxu3 %v1327_v11 }
  0x99   : > { %782 = vmatpush.bf16.msrb.mxu0 %v1309_v60 }
  0x9a   : > { %796 = vmatpush.bf16.msrb.mxu1 %v1317_v61 }
  0x9c   : > { %895 = vmatpush.bf16.msrb.mxu3 %v1326_v12 }
  0x9d   : > { %783 = vmatpush.bf16.msrb.mxu0 %v1308_v62 }
  0x9e   : > { %797 = vmatpush.bf16.msrb.mxu1 %v1316_v63 }
  0xa0   : > { %784 = vmatmul.bf16.vlgmr.msrb.gmra.mxu0 %v317_v4  ;;  %896 = vmatpush.bf16.msrb.mxu3 %v1325_v16 }
  0xa1   : > { %798 = vmatmul.bf16.vlgmr.msrb.gmra.mxu1 %v318_v5 }
  0xfd   : > { %v729_v13 = vpop.f32.mrf.mxu0 }
  0xfe   : > { %v743_v14 = vpop.f32.mrf.mxu1  ;;  %v730_v18 = vadd.f32 %v1408_v17, %v729_v13 }
 0x100   : > { %v744_v22 = vadd.f32 %v743_v14, %v730_v18 }
 0x105   : > { %v757_v15 = vpop.f32.mrf.mxu2  ;;  %v731_v19 = vpop.f32.mrf.mxu0 }
 0x106   : > { %v745_v20 = vpop.f32.mrf.mxu1  ;;  %v771_v23 = vpop.f32.mrf.mxu3  ;;  %v732_v24 = vadd.f32 %v1408_v17, %v731_v19  ;;  %v758_v25 = vadd.f32 %v757_v15, %v744_v22 }
 0x108   : > { %v746_v26 = vadd.f32 %v745_v20, %v732_v24  ;;  %v772_v29 = vadd.f32 %v771_v23, %v758_v25 }
 0x10d   : > { %v759_v21 = vpop.f32.mrf.mxu2 }
 0x10e   : > { %v760_v31 = vadd.f32 %v759_v21, %v746_v26  ;;  %v773_v33 = vpop.f32.mrf.mxu3 }
 0x110   : > { %v774_v34 = vadd.f32 %v773_v33, %v760_v31 }
 0x115   : > { %v813_v30 = vpop.f32.mrf.mxu2 }
 0x11d   : > { %v785_v27 = vpop.f32.mrf.mxu0  ;;  %v815_v41 = vpop.f32.mrf.mxu2 }
 0x11e   : > { %v799_v28 = vpop.f32.mrf.mxu1  ;;  %v786_v32 = vadd.f32 %v785_v27, %v772_v29 }
 0x120   : > { %v800_v35 = vadd.f32 %v799_v28, %v786_v32 }
 0x122   : > { %v814_v39 = vadd.f32 %v813_v30, %v800_v35 }
 0x124   : > { %v818_v43 = vmax.f32 %v814_v39, 0.0 }
 0x125   : > { %v787_v36 = vpop.f32.mrf.mxu0 }
 0x126   : > { %v788_v37 = vadd.f32 %v787_v36, %v774_v34  ;;  %v801_v38 = vpop.f32.mrf.mxu1 }
 0x128   : > { %v802_v40 = vadd.f32 %v801_v38, %v788_v37 }
 0x12a   : > { %v816_v42 = vadd.f32 %v815_v41, %v802_v40 }
 0x12c   : > { %v819_v44 = vmax.f32 %v816_v42, 0.0 }
 0x12e   : > { %v820_v45 = vpack.c.bf16 %v819_v44, %v818_v43 }
 0x130   : > { %897 = vmatmul.bf16.vlgmr.msrb.gmra.mxu3 %v820_v45 }
 0x1b3   : > { %v898_v46 = vpop.f32.mrf.mxu3 }
 0x1b4   : > { %v899_v49 = vadd.f32 %v1409_v47, %v898_v46 }
 0x1bb   : > { %v900_v48 = vpop.f32.mrf.mxu3 }
 0x1bc   : > { %v901_v50 = vadd.f32 %v1409_v47, %v900_v48  ;;  %914 = sbr.rel (!%p1684_p11) target bundleno = 480 (0x1e0), region = 56 }
 0x1be   : > { %v1337_v51 = vpack.c.bf16 %v901_v50, %v899_v49 }
 0x1c0   : > { %1338 = vst [vmem:[%s286_s9] sm:$0xff] %v1337_v51  }
 0x1c1   : > { %s1890_s12 = smov (!%p917_p6, %s916_s12), 2 }
 0x1c2   : > { %s1269_s25 = sshll.u32 %s1890_s12, 2 }
 0x1c3   : > { %s920_s8 = ssub.s32 8, %s1269_s25 }
 0x1c4   : > { %s921_s17 = sshll.u32 %s920_s8, 4 }
 0x1c5   : > { %922 = vsyncadd %s908_s26, %s921_s17  ;;  %p1800_p13 = scmp.ne.s32.totalorder %s1269_s25, 0  ;;  %s1333_s30 = sshll.u32 %s1653_s22, 3 }
 0x1c6   : > { %s925_s11 = scalar_lea.hbm %s1858_s5, %s1333_s30  ;;  %s927_s16 = sshll.u32 %s286_s9, 4  ;;  %s1808_s16 = int_to_ptr.vmem [resolvable:$true] %s927_s16 }
 0x1c7   : > { %s929_s29 = sshll.u32 %s925_s11, 4  ;;  %s1273_s7 = sshll.u32 %s1890_s12, 6  ;;  %s1810_s29 = int_to_ptr.hbm [resolvable:$true] %s929_s29 }
 0x1c8   : > { %s1509_s14 = sshra.s32 %s1808_s16, 4  ;;  %s1511_s28 = sshrl.u32 %s1273_s7, 4  ;;  %s1510_s14 = int_to_ptr.vmem [resolvable:$true] %s1509_s14 }
 0x1c9   : > { %s1516_s23 = scalar_lea.vmem %s1510_s14, %s1511_s28  ;;  %s1599_s22 = smov [#allocation8]  }
 0x1ca   : > { %p1517_p11 = scmp.ne.s32.totalorder %s1510_s14, %s1516_s23  ;;  %s1520_s13 = scalar_lea.vmem %s1599_s22, 16 }
 0x1cb   : > { %p1522_p10 = scmp.lt.s32.totalorder %s1520_s13, %s1516_s23 }
 0x1cc   : > { %p1518_p2 = pnand %p1517_p11, %p1800_p13 }
 0x1ce   : > { %p1519_p7 = pneg %p1518_p2 }
 0x1d0   : > { %p1524_p1 = pnand %p1522_p10, %p1519_p7 }
 0x1d2   : > { %1527 = shalt.err (!%p1524_p1)
}
 0x1d3   : > { %s1528_s9 = sshra.s32 %s1810_s29, 4  ;;  %s1539_s30 = scalar_lea.hbm %s1858_s5, 12  ;;  %s1529_s9 = int_to_ptr.hbm [resolvable:$true] %s1528_s9 }
 0x1d4   : > { %s1535_s25 = scalar_lea.hbm %s1529_s9, %s1511_s28  ;;  %p1540_p8 = scmp.lt.s32.totalorder %s1529_s9, %s1858_s5 }
 0x1d5   : > { %p1536_p0 = scmp.ne.s32.totalorder %s1529_s9, %s1535_s25  ;;  %p1541_p9 = scmp.lt.s32.totalorder %s1539_s30, %s1535_s25 }
 0x1d7   : > { %p1537_p3 = pnand %p1536_p0, %p1800_p13  ;;  %p1542_p4 = por %p1541_p9, %p1540_p8 }
 0x1d9   : > { %p1538_p5 = pneg %p1537_p3 }
 0x1db   : > { %p1543_p12 = pnand %p1542_p4, %p1538_p5 }
 0x1dd   : > { %1546 = shalt.err (!%p1543_p12)
}
 0x1de   : > { %s1600_s11 = smov 64   ;;  %s1601_s14 = smov 4  }
 0x1df   : > { %935 = dma.vmem_to_hbm [thread:$0]  (%p1800_p13), %s1808_s16, %s1273_s7, %s1810_s29, %s908_s26, %s1600_s11, %s1600_s11, %s1601_s14  }
 0x1e0 PF: > { %s944_s28 = sand.u32 1, %s1578_s18   ;;  %p1879_p6 = scmp.ne.s32.totalorder %s1868_s6, 0 }
 0x1e1   : > { %p1880_p11 = scmp.ge.s32.totalorder %s1590_s21, 2  ;;  %s945_s23 = scalar_lea.sflag [#allocation4], %s944_s28 }
 0x1e3   : > { %p1360_p2 = pnand %p1880_p11, %p1879_p6 }
 0x1e5   : > { %p1361_p7 = pneg %p1360_p2 }
 0x1e7   : > { %1573 = dma.done.wait (%p1361_p7), %s945_s23, 128  }
 0x1e8   : > { %1575 = vsyncadd (%p1361_p7), %s945_s23, 4294967168  ;;  %p19_p10 = scmp.ge.s32.totalorder %s1657_s24, 4   ;;  %s1881_s18 = smov %s1582_s19 }
 0x1e9   : > { %s1882_s19 = smov %s1586_s20  ;;  %s1883_s20 = smov %s1669_s27 }
 0x1ea   : > { %s1884_s21 = smov %s1657_s24  ;;  %21 = sbr.rel (!%p19_p10) target bundleno = 9 (0x9), region = 93 }
 0x1ef   :  { %951 = vsyncpa [#allocation3], 1 }
 0x1f0   :  { %953 = vsyncpa [#allocation3 + $0x1], 1 }
 0x1f1   :  { %954 = vsyncpa [#allocation6], 1 }
 0x1f2   :  { %955 = vsyncpa [#allocation4], 1 }
 0x1f3   :  { %957 = vsyncpa [#allocation4 + $0x1], 1 }

</bundles_post_ra>
